<compile_context>
chip_gen: v5e
topology: v5e:2x2
jax: 0.10.0
libtpu: 0.0.40
codegen_flags: <defaults>
</compile_context>

<pallas_src>
import jax
import jax.numpy as jnp
from jax.experimental import pallas as pl
from jax.experimental.pallas import tpu as pltpu

_LANES = 128                 # batch items per packed row
_FEATURES = 4                # nn.Linear(4, 1)
_PACK = _LANES * _FEATURES   # 512 lanes of x per packed row
_MAX_BLOCK_ROWS = 4096       # 4096 * 512 * 4 B = 8 MiB x-block per grid step


def _logreg_kernel(x_ref, w_ref, b_ref, o_ref):
    # x_ref: VMEM [TR, 512] f32 -- row r, lane 4j+f = x[128*r + j, f]
    # w_ref: VMEM [512, 128] f32 -- w_ref[4j+f, j] = weight[f], else 0
    # b_ref: SMEM (1,) f32
    # o_ref: VMEM [TR, 128] f32 -- o_ref[r, j] = sigmoid(logit(batch 128*r + j))
    z = jnp.dot(x_ref[...], w_ref[...],
                preferred_element_type=jnp.float32) + b_ref[0]
    # sigmoid via EUP exp + EUP approximate reciprocal (free while mem-bound).
    o_ref[...] = pl.reciprocal(1.0 + jnp.exp(-z), approx=True).astype(o_ref.dtype)


@jax.jit
def logistic_regression(x, weight, bias):
    """x: [B, 4] f32, weight: [1, 4] f32 (nn.Linear layout), bias: [1] f32.

    Returns sigmoid(x @ weight.T + bias) with shape [B, 1].
    """
    B, F = x.shape
    assert F == _FEATURES, "LogisticRegressionModel expects 4 input features"

    x32 = x.astype(jnp.float32)

    # Pad the batch only when needed (B % 128 != 0, or tiny B); for large
    # aligned B the reshape below is metadata-only -- no extra HBM pass.
    b_pad = max(pl.cdiv(B, _LANES) * _LANES, 8 * _LANES)
    if b_pad != B:
        x32 = jnp.pad(x32, ((0, b_pad - B), (0, 0)))
    rows = b_pad // _LANES
    x_r = x32.reshape(rows, _PACK)          # free row-major reshape

    # Block-diagonal "dot + compaction" matrix: W[4j+f, j] = weight[f].
    w_vec = weight.astype(jnp.float32).reshape(_FEATURES)
    sel = jnp.repeat(jnp.eye(_LANES, dtype=jnp.float32), _FEATURES, axis=0)
    w_mat = sel * jnp.tile(w_vec, _LANES)[:, None]          # [512, 128]
    b_flat = bias.astype(jnp.float32).reshape(1)             # (1,) -> SMEM

    # Batch tile (in packed rows): as large as possible (amortize the fixed
    # ~0.35us/step cost), multiple of 8 sublanes, capped at ceil(rows/2) so
    # the grid has >= 2 steps for v7x's two TensorCores.
    if rows <= 16:
        tr = rows                                            # single tiny block
    else:
        tr = min(_MAX_BLOCK_ROWS, (pl.cdiv(rows, 2) // 8) * 8)
    grid = (pl.cdiv(rows, tr),)

    out2d = pl.pallas_call(
        _logreg_kernel,
        out_shape=jax.ShapeDtypeStruct((rows, _LANES), jnp.float32),
        grid_spec=pltpu.PrefetchScalarGridSpec(
            num_scalar_prefetch=0,
            grid=grid,
            in_specs=[
                pl.BlockSpec((tr, _PACK), lambda i: (i, 0)),       # x rows
                pl.BlockSpec((_PACK, _LANES), lambda i: (0, 0)),   # weight matrix (invariant)
                pl.BlockSpec(memory_space=pltpu.MemorySpace.SMEM),  # bias scalar
            ],
            out_specs=pl.BlockSpec((tr, _LANES), lambda i: (i, 0)),
        ),
        compiler_params=pltpu.CompilerParams(
            dimension_semantics=("parallel",),
            vmem_limit_bytes=32 * 1024 * 1024,
        ),
    )(x_r, w_mat, b_flat)

    # [rows, 128] row-major == batch order -> metadata-only reshape to [B, 1].
    return out2d.reshape(b_pad, 1)[:B]


if __name__ == "__main__":
    key = jax.random.PRNGKey(0)
    kx, kw, kb, kx2 = jax.random.split(key, 4)

    B, F = 8, 4
    x = jax.random.normal(kx, (B, F), dtype=jnp.float32)

    # Deterministic init mirroring nn.Linear(4, 1): U(-1/sqrt(4), 1/sqrt(4))
    bound = 1.0 / jnp.sqrt(jnp.float32(F))
    weight = jax.random.uniform(kw, (1, F), minval=-bound, maxval=bound,
                                dtype=jnp.float32)
    bias = jax.random.uniform(kb, (1,), minval=-bound, maxval=bound,
                              dtype=jnp.float32)

    out = logistic_regression(x, weight, bias)
    jax.block_until_ready(out)

    # Elementwise f32 reference (same math as torch.sigmoid(linear(x))).
    # atol covers the approximate EUP reciprocal and MXU f32 pass rounding.
    ref = jax.nn.sigmoid(jnp.sum(x * weight.reshape(1, F), axis=1,
                                 keepdims=True) + bias)
    assert out.shape == (B, 1), out.shape
    assert jnp.allclose(out, ref, atol=5e-3), (out, ref)

    # Second small shape exercising the non-multiple-of-128 (padded) path.
    B2 = 200
    x2 = jax.random.normal(kx2, (B2, F), dtype=jnp.float32)
    out2 = logistic_regression(x2, weight, bias)
    jax.block_until_ready(out2)
    ref2 = jax.nn.sigmoid(jnp.sum(x2 * weight.reshape(1, F), axis=1,
                                  keepdims=True) + bias)
    assert out2.shape == (B2, 1), out2.shape
    assert jnp.allclose(out2, ref2, atol=5e-3), (out2, ref2)

    print("KERNEL_OK")
</pallas_src>

<mosaic_0001>
module attributes {stable_mosaic.version = 11 : i64} {
  func.func @_logreg_kernel(%arg0: i32, %arg1: memref<8x512xf32, #tpu.memory_space<vmem>>, %arg2: memref<512x128xf32, #tpu.memory_space<vmem>>, %arg3: memref<1xf32, #tpu.memory_space<smem>>, %arg4: memref<8x128xf32, #tpu.memory_space<vmem>>) attributes {dimension_semantics = [#tpu.dimension_semantics<parallel>], iteration_bounds = array<i64: 1>, scalar_prefetch = 0 : i64, scratch_operands = 0 : i64, tpu.core_type = #tpu.core_type<tc>, window_params = [{transform_indices = @transform_0, window_bounds = array<i64: 8, 512>}, {pipeline_mode = #tpu.pipeline_mode<synchronous>, transform_indices = @transform_1, window_bounds = array<i64: 512, 128>}, {transform_indices = @transform_2, window_bounds = array<i64: 1>}, {transform_indices = @transform_3, window_bounds = array<i64: 8, 128>}]} {
    %c0 = arith.constant 0 : index
    %c0_0 = arith.constant 0 : index
    %0 = vector.load %arg1[%c0, %c0_0] : memref<8x512xf32, #tpu.memory_space<vmem>>, vector<8x512xf32>
    %c0_1 = arith.constant 0 : index
    %c0_2 = arith.constant 0 : index
    %1 = vector.load %arg2[%c0_1, %c0_2] : memref<512x128xf32, #tpu.memory_space<vmem>>, vector<512x128xf32>
    %cst = arith.constant dense<0.000000e+00> : vector<8x128xf32>
    %2 = tpu.matmul %0, %1, %cst {dimension_numbers = #tpu.dot_dimension_numbers<[1], [0], [0], [1], [0, 0, 1, 1], [], []>} : vector<8x512xf32>, vector<512x128xf32>, vector<8x128xf32> -> vector<8x128xf32>
    %c0_3 = arith.constant 0 : index
    %3 = memref.load %arg3[%c0_3] : memref<1xf32, #tpu.memory_space<smem>>
    %4 = vector.broadcast %3 : f32 to vector<8x128xf32>
    %5 = arith.addf %2, %4 : vector<8x128xf32>
    %cst_4 = arith.constant 0.000000e+00 : f32
    %6 = vector.broadcast %cst_4 : f32 to vector<8x128xf32>
    %7 = arith.subf %6, %5 : vector<8x128xf32>
    %8 = math.exp %7 : vector<8x128xf32>
    %cst_5 = arith.constant 1.000000e+00 : f32
    %9 = vector.broadcast %cst_5 : f32 to vector<8x128xf32>
    %10 = arith.addf %9, %8 : vector<8x128xf32>
    %11 = tpu.reciprocal %10 {approx = true} : vector<8x128xf32> -> vector<8x128xf32>
    %c0_6 = arith.constant 0 : index
    %c0_7 = arith.constant 0 : index
    %12 = vector.load %arg4[%c0_6, %c0_7] : memref<8x128xf32, #tpu.memory_space<vmem>>, vector<8x128xf32>
    tpu.vector_store %arg4[%c0_6, %c0_7], %11 {strides = array<i32>} : memref<8x128xf32, #tpu.memory_space<vmem>>, vector<8x128xf32>,
    return
  }
  func.func @transform_0(%arg0: i32) -> (i32, i32) {
    %c0_i32 = arith.constant 0 : i32
    %c0_i32_0 = arith.constant 0 : i32
    return %arg0, %c0_i32 : i32, i32
  }
  func.func @transform_1(%arg0: i32) -> (i32, i32) {
    %c0_i32 = arith.constant 0 : i32
    %c0_i32_0 = arith.constant 0 : i32
    %c0_i32_1 = arith.constant 0 : i32
    return %c0_i32, %c0_i32_0 : i32, i32
  }
  func.func @transform_2(%arg0: i32) -> i32 {
    %c0_i32 = arith.constant 0 : i32
    %c0_i32_0 = arith.constant 0 : i32
    return %c0_i32 : i32
  }
  func.func @transform_3(%arg0: i32) -> (i32, i32) {
    %c0_i32 = arith.constant 0 : i32
    %c0_i32_0 = arith.constant 0 : i32
    return %arg0, %c0_i32 : i32, i32
  }
}

</mosaic_0001>

<bundles_post_ra>
// kernel: tile.6
= control target key start
LH: loop header
LB: loop body
LE: loop exit
PB: predicated region body
PF: predicated region fallthrough
CT: control target
= control target key end

     0   :  { %s112_s0 = inlined_call_operand.vmem [shape: f32[4], index: 0, kind: input, shape index: {}]   ;;  %s113_s1 = inlined_call_operand.vmem [shape: f32[128,4], index: 1, kind: output, shape index: {}]  }
   0x1   :  { %v4_v0 = vld [vmem:[%s112_s0] ss:$0 sm:$0xff] }
   0x2   :  { %5 = vst [vmem:[%s113_s1] sm:$0xff] %v4_v0 }
   0x3   :  { %36 = vst [vmem:[%s113_s1 + $0x8] sm:$0xff] %v4_v0 }
   0x4   :  { %37 = vst [vmem:[%s113_s1 + $0x10] sm:$0xff] %v4_v0 }
   0x5   :  { %38 = vst [vmem:[%s113_s1 + $0x18] sm:$0xff] %v4_v0 }
   0x6   :  { %39 = vst [vmem:[%s113_s1 + $0x20] sm:$0xff] %v4_v0 }
   0x7   :  { %40 = vst [vmem:[%s113_s1 + $0x28] sm:$0xff] %v4_v0 }
   0x8   :  { %41 = vst [vmem:[%s113_s1 + $0x30] sm:$0xff] %v4_v0 }
   0x9   :  { %42 = vst [vmem:[%s113_s1 + $0x38] sm:$0xff] %v4_v0 }
   0xa   :  { %43 = vst [vmem:[%s113_s1 + $0x40] sm:$0xff] %v4_v0 }
   0xb   :  { %44 = vst [vmem:[%s113_s1 + $0x48] sm:$0xff] %v4_v0 }
   0xc   :  { %45 = vst [vmem:[%s113_s1 + $0x50] sm:$0xff] %v4_v0 }
   0xd   :  { %46 = vst [vmem:[%s113_s1 + $0x58] sm:$0xff] %v4_v0 }
   0xe   :  { %47 = vst [vmem:[%s113_s1 + $0x60] sm:$0xff] %v4_v0 }
   0xf   :  { %48 = vst [vmem:[%s113_s1 + $0x68] sm:$0xff] %v4_v0 }
  0x10   :  { %49 = vst [vmem:[%s113_s1 + $0x70] sm:$0xff] %v4_v0 }
  0x11   :  { %50 = vst [vmem:[%s113_s1 + $0x78] sm:$0xff] %v4_v0 }

// kernel: mul.5
= control target key start
LH: loop header
LB: loop body
LE: loop exit
PB: predicated region body
PF: predicated region fallthrough
CT: control target
= control target key end

     0   :  { %vm5_vm0 = vcmask 1041409   ;;  %vm9_vm1 = vcmask 1042434   ;;  %vm13_vm2 = vcmask 1043459   ;;  %s739_s28 = smov 124   ;;  %s740_s6 = smov 116   ;;  %vm15_vm3 = vcmask 31744   ;;  %s1263_s0 = inlined_call_operand.vmem [shape: f32[128,4], index: 0, kind: input, shape index: {}]   ;;  %s1264_s1 = inlined_call_operand.vmem [shape: f32[512], index: 1, kind: output, shape index: {}]  }
   0x1   :  { %v584_v0 = vld [vmem:[%s1263_s0 + $0x1f] sm:$0x1]   ;;  %v592_v5 = vld [vmem:[%s1263_s0 + $0x1d] sm:$0x1]   ;;  %v588_v11 = vld [vmem:[%s1263_s0 + $0x1e] sm:$0x1]  }
   0x2   :  { %v585_v1 = vld [vmem:[%s1263_s0 + $0x3e] sm:$0x2]   ;;  %v593_v6 = vld [vmem:[%s1263_s0 + $0x3c] sm:$0x2]   ;;  %v589_v14 = vld [vmem:[%s1263_s0 + $0x3d] sm:$0x2]  }
   0x3   :  { %v586_v2 = vld [vmem:[%s1263_s0 + $0x5d] sm:$0x4]   ;;  %v22_v4 = vsel %vm5_vm0, %v585_v1, %v584_v0  ;;  %v594_v7 = vld [vmem:[%s1263_s0 + $0x5b] sm:$0x4]   ;;  %v58_v9 = vsel %vm5_vm0, %v593_v6, %v592_v5  ;;  %v590_v15 = vld [vmem:[%s1263_s0 + $0x5c] sm:$0x4]   ;;  %v40_v17 = vsel %vm5_vm0, %v589_v14, %v588_v11 }
   0x4   :  { %v587_v3 = vld [vmem:[%s1263_s0 + $0x7c] sm:$0x8]   ;;  %v26_v8 = vsel %vm9_vm1, %v586_v2, %v22_v4  ;;  %v595_v10 = vld [vmem:[%s1263_s0 + $0x7a] sm:$0x8]   ;;  %v62_v13 = vsel %vm9_vm1, %v594_v7, %v58_v9  ;;  %v596_v18 = vld [vmem:[%s1263_s0 + $0x1c] sm:$0x1]   ;;  %v44_v22 = vsel %vm9_vm1, %v590_v15, %v40_v17 }
   0x5   :  { %v30_v12 = vsel %vm13_vm2, %v587_v3, %v26_v8  ;;  %v66_v16 = vsel %vm13_vm2, %v595_v10, %v62_v13  ;;  %v597_v19 = vld [vmem:[%s1263_s0 + $0x3b] sm:$0x2]   ;;  %v591_v23 = vld [vmem:[%s1263_s0 + $0x7b] sm:$0x8]   ;;  %v608_v26 = vld [vmem:[%s1263_s0 + $0x19] sm:$0x1]  }
   0x6   :  { %31 = vrot.lane.b32.xlu0 %v30_v12, %s739_s28  ;;  %v598_v20 = vld [vmem:[%s1263_s0 + $0x5a] sm:$0x4]   ;;  %67 = vrot.lane.b32.xlu1 %v66_v16, %s740_s6  ;;  %v76_v21 = vsel %vm5_vm0, %v597_v19, %v596_v18  ;;  %v609_v27 = vld [vmem:[%s1263_s0 + $0x38] sm:$0x2]   ;;  %v48_v28 = vsel %vm13_vm2, %v591_v23, %v44_v22  ;;  %s741_s25 = smov 120   ;;  %s742_s3 = smov 112  }
   0x7   :  { %v80_v24 = vsel %vm9_vm1, %v598_v20, %v76_v21  ;;  %v599_v25 = vld [vmem:[%s1263_s0 + $0x79] sm:$0x8]   ;;  %v612_v29 = vld [vmem:[%s1263_s0 + $0x18] sm:$0x1]   ;;  %v130_v32 = vsel %vm5_vm0, %v609_v27, %v608_v26  ;;  %v610_v33 = vld [vmem:[%s1263_s0 + $0x57] sm:$0x4]  }
   0x8   :  { %v613_v30 = vld [vmem:[%s1263_s0 + $0x37] sm:$0x2]   ;;  %v84_v31 = vsel %vm13_vm2, %v599_v25, %v80_v24  ;;  %v600_v35 = vld [vmem:[%s1263_s0 + $0x1b] sm:$0x1]   ;;  %v134_v41 = vsel %vm9_vm1, %v610_v33, %v130_v32  ;;  %v611_v42 = vld [vmem:[%s1263_s0 + $0x76] sm:$0x8]  }
   0x9   :  { %v614_v34 = vld [vmem:[%s1263_s0 + $0x56] sm:$0x4]   ;;  %v148_v36 = vsel %vm5_vm0, %v613_v30, %v612_v29  ;;  %v601_v37 = vld [vmem:[%s1263_s0 + $0x3a] sm:$0x2]   ;;  %v620_v46 = vld [vmem:[%s1263_s0 + $0x16] sm:$0x1]   ;;  %v138_v52 = vsel %vm13_vm2, %v611_v42, %v134_v41 }
   0xa   :  { %v602_v38 = vld [vmem:[%s1263_s0 + $0x59] sm:$0x4]   ;;  %v94_v40 = vsel %vm5_vm0, %v601_v37, %v600_v35  ;;  %v152_v44 = vsel %vm9_vm1, %v614_v34, %v148_v36  ;;  %v615_v45 = vld [vmem:[%s1263_s0 + $0x75] sm:$0x8]   ;;  %v621_v47 = vld [vmem:[%s1263_s0 + $0x35] sm:$0x2]  }
   0xb   :  { %v603_v39 = vld [vmem:[%s1263_s0 + $0x78] sm:$0x8]   ;;  %v98_v43 = vsel %vm9_vm1, %v602_v38, %v94_v40  ;;  %s743_s12 = smov 108   ;;  %v604_v49 = vld [vmem:[%s1263_s0 + $0x1a] sm:$0x1]   ;;  %v156_v56 = vsel %vm13_vm2, %v615_v45, %v152_v44  ;;  %v184_v59 = vsel %vm5_vm0, %v621_v47, %v620_v46  ;;  %s744_s27 = smov 100  }
   0xc   :  { %v102_v48 = vsel %vm13_vm2, %v603_v39, %v98_v43  ;;  %v605_v50 = vld [vmem:[%s1263_s0 + $0x39] sm:$0x2]   ;;  %v624_v53 = vld [vmem:[%s1263_s0 + $0x15] sm:$0x1]   ;;  %v622_v60 = vld [vmem:[%s1263_s0 + $0x54] sm:$0x4]  }
   0xd   :  { %103 = vrot.lane.b32.xlu2 %v102_v48, %s743_s12  ;;  %v606_v51 = vld [vmem:[%s1263_s0 + $0x58] sm:$0x4]   ;;  %v625_v54 = vld [vmem:[%s1263_s0 + $0x34] sm:$0x2]   ;;  %v112_v55 = vsel %vm5_vm0, %v605_v50, %v604_v49  ;;  %v616_v63 = vld [vmem:[%s1263_s0 + $0x17] sm:$0x1]   ;;  %v188_v2 = vsel %vm9_vm1, %v622_v60, %v184_v59 }
   0xe   :  { %49 = vrot.lane.b32.xlu0 %v48_v28, %s741_s25  ;;  %85 = vrot.lane.b32.xlu1 %v84_v31, %s742_s3  ;;  %v116_v57 = vsel %vm9_vm1, %v606_v51, %v112_v55  ;;  %v607_v58 = vld [vmem:[%s1263_s0 + $0x77] sm:$0x8]   ;;  %v202_v61 = vsel %vm5_vm0, %v625_v54, %v624_v53  ;;  %v626_v62 = vld [vmem:[%s1263_s0 + $0x53] sm:$0x4]   ;;  %s745_s3 = smov 96   ;;  %s746_s16 = smov 104  }
   0xf   :  { %v120_v0 = vsel %vm13_vm2, %v607_v58, %v116_v57  ;;  %v617_v1 = vld [vmem:[%s1263_s0 + $0x36] sm:$0x2]   ;;  %v623_v3 = vld [vmem:[%s1263_s0 + $0x73] sm:$0x8]   ;;  %v206_v4 = vsel %vm9_vm1, %v626_v62, %v202_v61  ;;  %v627_v5 = vld [vmem:[%s1263_s0 + $0x72] sm:$0x8]  }
  0x10   :  { %v166_v6 = vsel %vm5_vm0, %v617_v1, %v616_v63  ;;  %v618_v7 = vld [vmem:[%s1263_s0 + $0x55] sm:$0x4]   ;;  %v632_v8 = vld [vmem:[%s1263_s0 + $0x13] sm:$0x1]   ;;  %v192_v10 = vsel %vm13_vm2, %v623_v3, %v188_v2  ;;  %v636_v11 = vld [vmem:[%s1263_s0 + $0x12] sm:$0x1]   ;;  %v210_v13 = vsel %vm13_vm2, %v627_v5, %v206_v4 }
  0x11   :  { %v633_v9 = vld [vmem:[%s1263_s0 + $0x32] sm:$0x2]   ;;  %v637_v12 = vld [vmem:[%s1263_s0 + $0x31] sm:$0x2]   ;;  %v170_v14 = vsel %vm9_vm1, %v618_v7, %v166_v6  ;;  %v619_v15 = vld [vmem:[%s1263_s0 + $0x74] sm:$0x8]  }
  0x12   :  { %v238_v16 = vsel %vm5_vm0, %v633_v9, %v632_v8  ;;  %v634_v17 = vld [vmem:[%s1263_s0 + $0x51] sm:$0x4]   ;;  %s747_s25 = smov 88   ;;  %v256_v18 = vsel %vm5_vm0, %v637_v12, %v636_v11  ;;  %v638_v19 = vld [vmem:[%s1263_s0 + $0x50] sm:$0x4]   ;;  %v174_v22 = vsel %vm13_vm2, %v619_v15, %v170_v14  ;;  %s749_s14 = smov 92  }
  0x13   :  { %v628_v20 = vld [vmem:[%s1263_s0 + $0x14] sm:$0x1]   ;;  %v242_v23 = vsel %vm9_vm1, %v634_v17, %v238_v16  ;;  %v635_v24 = vld [vmem:[%s1263_s0 + $0x70] sm:$0x8]   ;;  %v260_v25 = vsel %vm9_vm1, %v638_v19, %v256_v18  ;;  %v639_v26 = vld [vmem:[%s1263_s0 + $0x6f] sm:$0x8]  }
  0x14   :  { %v629_v21 = vld [vmem:[%s1263_s0 + $0x33] sm:$0x2]   ;;  %v644_v29 = vld [vmem:[%s1263_s0 + $0x10] sm:$0x1]   ;;  %v246_v31 = vsel %vm13_vm2, %v635_v24, %v242_v23  ;;  %v648_v32 = vld [vmem:[%s1263_s0 + $0xf] sm:$0x1]   ;;  %v264_v34 = vsel %vm13_vm2, %v639_v26, %v260_v25 }
  0x15   :  { %121 = vrot.lane.b32.xlu2 %v120_v0, %s746_s16  ;;  %v220_v27 = vsel %vm5_vm0, %v629_v21, %v628_v20  ;;  %v630_v28 = vld [vmem:[%s1263_s0 + $0x52] sm:$0x4]   ;;  %v645_v30 = vld [vmem:[%s1263_s0 + $0x2f] sm:$0x2]   ;;  %v649_v33 = vld [vmem:[%s1263_s0 + $0x2e] sm:$0x2]  }
  0x16   :  { %139 = vrot.lane.b32.xlu0 %v138_v52, %s744_s27  ;;  %157 = vrot.lane.b32.xlu1 %v156_v56, %s745_s3  ;;  %s748_s3 = smov 84   ;;  %v224_v35 = vsel %vm9_vm1, %v630_v28, %v220_v27  ;;  %v631_v36 = vld [vmem:[%s1263_s0 + $0x71] sm:$0x8]   ;;  %v292_v37 = vsel %vm5_vm0, %v645_v30, %v644_v29  ;;  %v646_v38 = vld [vmem:[%s1263_s0 + $0x4e] sm:$0x4]   ;;  %s750_s23 = smov 76   ;;  %v310_v39 = vsel %vm5_vm0, %v649_v33, %v648_v32 }
  0x17   :  { %v650_v40 = vld [vmem:[%s1263_s0 + $0x4d] sm:$0x4]   ;;  %v640_v41 = vld [vmem:[%s1263_s0 + $0x11] sm:$0x1]   ;;  %s751_s30 = smov 72   ;;  %v228_v43 = vsel %vm13_vm2, %v631_v36, %v224_v35  ;;  %v296_v44 = vsel %vm9_vm1, %v646_v38, %v292_v37  ;;  %s752_s12 = smov 80  }
  0x18   :  { %v641_v42 = vld [vmem:[%s1263_s0 + $0x30] sm:$0x2]   ;;  %v647_v45 = vld [vmem:[%s1263_s0 + $0x6d] sm:$0x8]   ;;  %v314_v46 = vsel %vm9_vm1, %v650_v40, %v310_v39  ;;  %v651_v47 = vld [vmem:[%s1263_s0 + $0x6c] sm:$0x8]  }
  0x19   :  { %v274_v48 = vsel %vm5_vm0, %v641_v42, %v640_v41  ;;  %v642_v49 = vld [vmem:[%s1263_s0 + $0x4f] sm:$0x4]   ;;  %v656_v50 = vld [vmem:[%s1263_s0 + $0xd] sm:$0x1]   ;;  %v300_v52 = vsel %vm13_vm2, %v647_v45, %v296_v44  ;;  %v660_v53 = vld [vmem:[%s1263_s0 + $0xc] sm:$0x1]   ;;  %v318_v55 = vsel %vm13_vm2, %v651_v47, %v314_v46 }
  0x1a   :  { %v657_v51 = vld [vmem:[%s1263_s0 + $0x2c] sm:$0x2]   ;;  %v661_v54 = vld [vmem:[%s1263_s0 + $0x2b] sm:$0x2]   ;;  %v278_v56 = vsel %vm9_vm1, %v642_v49, %v274_v48  ;;  %v643_v57 = vld [vmem:[%s1263_s0 + $0x6e] sm:$0x8]  }
  0x1b   :  { %v346_v58 = vsel %vm5_vm0, %v657_v51, %v656_v50  ;;  %v658_v59 = vld [vmem:[%s1263_s0 + $0x4b] sm:$0x4]   ;;  %s753_s21 = smov 64   ;;  %v364_v60 = vsel %vm5_vm0, %v661_v54, %v660_v53  ;;  %v662_v61 = vld [vmem:[%s1263_s0 + $0x4a] sm:$0x4]   ;;  %s754_s28 = smov 60   ;;  %v282_v0 = vsel %vm13_vm2, %v643_v57, %v278_v56 }
  0x1c   :  { %v652_v62 = vld [vmem:[%s1263_s0 + $0xe] sm:$0x1]   ;;  %v350_v1 = vsel %vm9_vm1, %v658_v59, %v346_v58  ;;  %v659_v2 = vld [vmem:[%s1263_s0 + $0x6a] sm:$0x8]   ;;  %v368_v3 = vsel %vm9_vm1, %v662_v61, %v364_v60  ;;  %v663_v4 = vld [vmem:[%s1263_s0 + $0x69] sm:$0x8]  }
  0x1d   :  { %175 = vrot.lane.b32.xlu2 %v174_v22, %s749_s14  ;;  %v653_v63 = vld [vmem:[%s1263_s0 + $0x2d] sm:$0x2]   ;;  %v668_v7 = vld [vmem:[%s1263_s0 + $0xa] sm:$0x1]   ;;  %s755_s10 = smov 68   ;;  %v354_v9 = vsel %vm13_vm2, %v659_v2, %v350_v1  ;;  %v372_v12 = vsel %vm13_vm2, %v663_v4, %v368_v3  ;;  %s756_s19 = smov 52  }
  0x1e   :  { %193 = vrot.lane.b32.xlu0 %v192_v10, %s747_s25  ;;  %211 = vrot.lane.b32.xlu1 %v210_v13, %s748_s3  ;;  %v328_v5 = vsel %vm5_vm0, %v653_v63, %v652_v62  ;;  %v654_v6 = vld [vmem:[%s1263_s0 + $0x4c] sm:$0x4]   ;;  %v669_v8 = vld [vmem:[%s1263_s0 + $0x29] sm:$0x2]   ;;  %s757_s26 = smov 48   ;;  %s758_s8 = smov 56  }
  0x1f   :  { %v672_v10 = vld [vmem:[%s1263_s0 + $0x9] sm:$0x1]   ;;  %v332_v13 = vsel %vm9_vm1, %v654_v6, %v328_v5  ;;  %v655_v14 = vld [vmem:[%s1263_s0 + $0x6b] sm:$0x8]   ;;  %v400_v15 = vsel %vm5_vm0, %v669_v8, %v668_v7  ;;  %v670_v16 = vld [vmem:[%s1263_s0 + $0x48] sm:$0x4]  }
  0x20   :  { %v673_v11 = vld [vmem:[%s1263_s0 + $0x28] sm:$0x2]   ;;  %v664_v19 = vld [vmem:[%s1263_s0 + $0xb] sm:$0x1]   ;;  %v336_v21 = vsel %vm13_vm2, %v655_v14, %v332_v13  ;;  %v404_v22 = vsel %vm9_vm1, %v670_v16, %v400_v15  ;;  %v671_v23 = vld [vmem:[%s1263_s0 + $0x67] sm:$0x8]  }
  0x21   :  { %v418_v17 = vsel %vm5_vm0, %v673_v11, %v672_v10  ;;  %v674_v18 = vld [vmem:[%s1263_s0 + $0x47] sm:$0x4]   ;;  %v665_v20 = vld [vmem:[%s1263_s0 + $0x2a] sm:$0x2]   ;;  %v680_v28 = vld [vmem:[%s1263_s0 + $0x7] sm:$0x1]   ;;  %v408_v30 = vsel %vm13_vm2, %v671_v23, %v404_v22 }
  0x22   :  { %v422_v24 = vsel %vm9_vm1, %v674_v18, %v418_v17  ;;  %v675_v25 = vld [vmem:[%s1263_s0 + $0x66] sm:$0x8]   ;;  %v382_v26 = vsel %vm5_vm0, %v665_v20, %v664_v19  ;;  %v666_v27 = vld [vmem:[%s1263_s0 + $0x49] sm:$0x4]   ;;  %v681_v29 = vld [vmem:[%s1263_s0 + $0x26] sm:$0x2]  }
  0x23   :  { %v685_v32 = vld [vmem:[%s1263_s0 + $0x25] sm:$0x2]   ;;  %v426_v33 = vsel %vm13_vm2, %v675_v25, %v422_v24  ;;  %v667_v35 = vld [vmem:[%s1263_s0 + $0x68] sm:$0x8]   ;;  %v454_v36 = vsel %vm5_vm0, %v681_v29, %v680_v28  ;;  %v682_v37 = vld [vmem:[%s1263_s0 + $0x45] sm:$0x4]  }
  0x24   :  { %s759_s17 = smov 40   ;;  %v686_v39 = vld [vmem:[%s1263_s0 + $0x44] sm:$0x4]   ;;  %v676_v40 = vld [vmem:[%s1263_s0 + $0x8] sm:$0x1]   ;;  %s760_s24 = smov 36  }
  0x25   :  { %229 = vrot.lane.b32.xlu2 %v228_v43, %s752_s12  ;;  %v677_v41 = vld [vmem:[%s1263_s0 + $0x27] sm:$0x2]   ;;  %v458_v43 = vsel %vm9_vm1, %v682_v37, %v454_v36  ;;  %v683_v44 = vld [vmem:[%s1263_s0 + $0x64] sm:$0x8]   ;;  %v687_v46 = vld [vmem:[%s1263_s0 + $0x63] sm:$0x8]  }
  0x26   :  { %247 = vrot.lane.b32.xlu0 %v246_v31, %s750_s23  ;;  %265 = vrot.lane.b32.xlu1 %v264_v34, %s751_s30  ;;  %v684_v31 = vld [vmem:[%s1263_s0 + $0x6] sm:$0x1]   ;;  %v386_v34 = vsel %vm9_vm1, %v666_v27, %v382_v26  ;;  %v436_v47 = vsel %vm5_vm0, %v677_v41, %v676_v40  ;;  %v678_v48 = vld [vmem:[%s1263_s0 + $0x46] sm:$0x4]   ;;  %s761_s6 = smov 44   ;;  %v462_v51 = vsel %vm13_vm2, %v683_v44, %v458_v43  ;;  %s762_s15 = smov 28  }
  0x27   :  { %v472_v38 = vsel %vm5_vm0, %v685_v32, %v684_v31  ;;  %v390_v42 = vsel %vm13_vm2, %v667_v35, %v386_v34  ;;  %v692_v49 = vld [vmem:[%s1263_s0 + $0x4] sm:$0x1]   ;;  %v697_v53 = vld [vmem:[%s1263_s0 + $0x22] sm:$0x2]   ;;  %v679_v56 = vld [vmem:[%s1263_s0 + $0x65] sm:$0x8]  }
  0x28   :  { %v476_v45 = vsel %vm9_vm1, %v686_v39, %v472_v38  ;;  %v693_v50 = vld [vmem:[%s1263_s0 + $0x23] sm:$0x2]   ;;  %v698_v60 = vld [vmem:[%s1263_s0 + $0x41] sm:$0x4]   ;;  %v688_v61 = vld [vmem:[%s1263_s0 + $0x5] sm:$0x1]  }
  0x29   :  { %v480_v54 = vsel %vm13_vm2, %v687_v46, %v476_v45  ;;  %v508_v57 = vsel %vm5_vm0, %v693_v50, %v692_v49  ;;  %v694_v58 = vld [vmem:[%s1263_s0 + $0x42] sm:$0x4]   ;;  %v689_v62 = vld [vmem:[%s1263_s0 + $0x24] sm:$0x2]   ;;  %s763_s22 = smov 24   ;;  %s764_s4 = smov 32  }
  0x2a   :  { %v695_v1 = vld [vmem:[%s1263_s0 + $0x61] sm:$0x8]   ;;  %v699_v3 = vld [vmem:[%s1263_s0 + $0x60] sm:$0x8]   ;;  %v490_v4 = vsel %vm5_vm0, %v689_v62, %v688_v61  ;;  %v690_v5 = vld [vmem:[%s1263_s0 + $0x43] sm:$0x4]  }
  0x2b   :  { %v704_v6 = vld [vmem:[%s1263_s0 + $0x1] sm:$0x1]   ;;  %v494_v10 = vsel %vm9_vm1, %v690_v5, %v490_v4  ;;  %v691_v11 = vld [vmem:[%s1263_s0 + $0x62] sm:$0x8]   ;;  %s765_s9 = smov 16   ;;  %s766_s14 = smov 12  }
  0x2c   :  { %v705_v7 = vld [vmem:[%s1263_s0 + $0x20] sm:$0x2]   ;;  %v700_v14 = vld [vmem:[%s1263_s0 + $0x2] sm:$0x1]   ;;  %v498_v16 = vsel %vm13_vm2, %v691_v11, %v494_v10  ;;  %v582_v23 = vld [vmem:[%s1263_s0 + $0x3e] sm:$0x4]  }
  0x2d   :  { %283 = vrot.lane.b32.xlu2 %v282_v0, %s755_s10  ;;  %v512_v0 = vsel %vm9_vm1, %v694_v58, %v508_v57  ;;  %v706_v13 = vld [vmem:[%s1263_s0 + $0x3f] sm:$0x4]   ;;  %v701_v15 = vld [vmem:[%s1263_s0 + $0x21] sm:$0x2]   ;;  %v583_v25 = vld [vmem:[%s1263_s0 + $0x5d] sm:$0x8]  }
  0x2e   :  { %301 = vrot.lane.b32.xlu0 %v300_v52, %s753_s21  ;;  %319 = vrot.lane.b32.xlu1 %v318_v55, %s754_s28  ;;  %v696_v52 = vld [vmem:[%s1263_s0 + $0x3] sm:$0x1]   ;;  %v440_v55 = vsel %vm9_vm1, %v678_v48, %v436_v47  ;;  %v516_v8 = vsel %vm13_vm2, %v695_v1, %v512_v0  ;;  %v707_v18 = vld [vmem:[%s1263_s0 + $0x5e] sm:$0x8]   ;;  %v544_v19 = vsel %vm5_vm0, %v701_v15, %v700_v14  ;;  %s769_s30 = smov 8   ;;  %vm33_vm4 = vcmask 1048544  }
  0x2f   :  { %v526_v59 = vsel %vm5_vm0, %v697_v53, %v696_v52  ;;  %v444_v63 = vsel %vm13_vm2, %v679_v56, %v440_v55  ;;  %v702_v20 = vld [vmem:[%s1263_s0 + $0x40] sm:$0x4]   ;;  %v2_v26 = vld [vmem:[%s1263_s0] sm:$0x1]   ;;  %vm51_vm5 = vcmask 1015744   ;;  %vm69_vm6 = vcmask 982944  }
  0x30   :  { %v530_v2 = vsel %vm9_vm1, %v698_v60, %v526_v59  ;;  %v703_v22 = vld [vmem:[%s1263_s0 + $0x5f] sm:$0x8]   ;;  %v548_v24 = vsel %vm9_vm1, %v702_v20, %v544_v19  ;;  %v581_v27 = vld [vmem:[%s1263_s0 + $0x1f] sm:$0x2]   ;;  %s768_s0 = smov 4   ;;  %vm87_vm7 = vcmask 950144  }
  0x31   :  { %v6_v28 = vsel %vm5_vm0, %v581_v27, %v2_v26  ;;  %vm105_vm8 = vcmask 917344   ;;  %vm123_vm9 = vcmask 884544   ;;  %vm141_vm10 = vcmask 851744  }
  0x32   :  { %v10_v29 = vsel %vm9_vm1, %v582_v23, %v6_v28  ;;  %vm159_vm11 = vcmask 818944   ;;  %vm177_vm12 = vcmask 786144   ;;  %vm195_vm13 = vcmask 753344  }
  0x33   :  { %v14_v31 = vsel %vm13_vm2, %v583_v25, %v10_v29  ;;  %vm213_vm14 = vcmask 720544   ;;  %vm231_vm15 = vcmask 687744  }
  0x34   :  { %16 = vst.msk [vmem:[#allocation0] sm:$0xf] %vm15_vm3, %v14_v31   ;;  %vm303_vm3 = vcmask 556544  }
  0x35   :  { %337 = vrot.lane.b32.xlu2 %v336_v21, %s758_s8 }
  0x36   :  { %355 = vrot.lane.b32.xlu0 %v354_v9, %s756_s19  ;;  %373 = vrot.lane.b32.xlu1 %v372_v12, %s757_s26  ;;  %v534_v9 = vsel %vm13_vm2, %v699_v3, %v530_v2  ;;  %v562_v12 = vsel %vm5_vm0, %v705_v7, %v704_v6  ;;  %s767_s19 = smov 20   ;;  %vm249_vm0 = vcmask 654944  }
  0x37   :  { %v566_v17 = vsel %vm9_vm1, %v706_v13, %v562_v12  ;;  %vm267_vm1 = vcmask 622144  }
  0x38   :  { %v570_v21 = vsel %vm13_vm2, %v707_v18, %v566_v17 }
  0x3d   :  { %391 = vrot.lane.b32.xlu2 %v390_v42, %s761_s6 }
  0x3e   :  { %409 = vrot.lane.b32.xlu0 %v408_v30, %s759_s17  ;;  %427 = vrot.lane.b32.xlu1 %v426_v33, %s760_s24  ;;  %v552_v30 = vsel %vm13_vm2, %v703_v22, %v548_v24  ;;  %vm285_vm2 = vcmask 589344  }
  0x45   :  { %445 = vrot.lane.b32.xlu2 %v444_v63, %s764_s4 }
  0x46   :  { %463 = vrot.lane.b32.xlu0 %v462_v51, %s762_s15  ;;  %481 = vrot.lane.b32.xlu1 %v480_v54, %s763_s22 }
  0x4d   :  { %499 = vrot.lane.b32.xlu2 %v498_v16, %s767_s19 }
  0x4e   :  { %517 = vrot.lane.b32.xlu0 %v516_v8, %s765_s9  ;;  %535 = vrot.lane.b32.xlu1 %v534_v9, %s766_s14 }
  0x55   :  { %553 = vrot.lane.b32.xlu2 %v552_v30, %s769_s30 }
  0x56   :  { %571 = vrot.lane.b32.xlu0 %v570_v21, %s768_s0 }
  0x67   :  { %v104_v32 = vpop.permute.xlu2 %103  }
  0x6f   :  { %v122_v33 = vpop.permute.xlu2 %121  }
  0x77   :  { %v176_v36 = vpop.permute.xlu2 %175  }
  0x78   :  { %v32_v34 = vpop.permute.xlu0 %31   ;;  %v68_v35 = vpop.permute.xlu1 %67  }
  0x79   :  { %34 = vst.msk [vmem:[#allocation0] sm:$0xf] %vm33_vm4, %v32_v34   ;;  %vm321_vm4 = vcmask 523744  }
  0x7f   :  { %v230_v39 = vpop.permute.xlu2 %229  }
  0x80   :  { %v50_v37 = vpop.permute.xlu0 %49   ;;  %v86_v38 = vpop.permute.xlu1 %85  }
  0x81   :  { %52 = vst.msk [vmem:[#allocation0] sm:$0xf] %vm51_vm5, %v50_v37   ;;  %vm339_vm5 = vcmask 490944  }
  0x82   :  { %70 = vst.msk [vmem:[#allocation0] sm:$0xf] %vm69_vm6, %v68_v35   ;;  %vm357_vm6 = vcmask 458144  }
  0x83   :  { %88 = vst.msk [vmem:[#allocation0] sm:$0xf] %vm87_vm7, %v86_v38   ;;  %vm375_vm7 = vcmask 425344  }
  0x84   :  { %106 = vst.msk [vmem:[#allocation0] sm:$0xf] %vm105_vm8, %v104_v32   ;;  %vm393_vm8 = vcmask 392544  }
  0x85   :  { %124 = vst.msk [vmem:[#allocation0] sm:$0xf] %vm123_vm9, %v122_v33   ;;  %vm411_vm9 = vcmask 359744  }
  0x87   :  { %v284_v42 = vpop.permute.xlu2 %283  }
  0x88   :  { %v140_v40 = vpop.permute.xlu0 %139   ;;  %v158_v41 = vpop.permute.xlu1 %157  }
  0x89   :  { %142 = vst.msk [vmem:[#allocation0] sm:$0xf] %vm141_vm10, %v140_v40   ;;  %vm429_vm10 = vcmask 326944  }
  0x8a   :  { %160 = vst.msk [vmem:[#allocation0] sm:$0xf] %vm159_vm11, %v158_v41   ;;  %vm447_vm11 = vcmask 294144  }
  0x8b   :  { %178 = vst.msk [vmem:[#allocation0] sm:$0xf] %vm177_vm12, %v176_v36   ;;  %vm465_vm12 = vcmask 261344  }
  0x8f   :  { %v338_v45 = vpop.permute.xlu2 %337  }
  0x90   :  { %v194_v43 = vpop.permute.xlu0 %193   ;;  %v212_v44 = vpop.permute.xlu1 %211  }
  0x91   :  { %196 = vst.msk [vmem:[#allocation0] sm:$0xf] %vm195_vm13, %v194_v43   ;;  %vm483_vm13 = vcmask 228544  }
  0x92   :  { %214 = vst.msk [vmem:[#allocation0] sm:$0xf] %vm213_vm14, %v212_v44   ;;  %vm501_vm14 = vcmask 195744  }
  0x93   :  { %232 = vst.msk [vmem:[#allocation0] sm:$0xf] %vm231_vm15, %v230_v39   ;;  %vm519_vm15 = vcmask 162944  }
  0x97   :  { %v392_v48 = vpop.permute.xlu2 %391  }
  0x98   :  { %v248_v46 = vpop.permute.xlu0 %247   ;;  %v266_v47 = vpop.permute.xlu1 %265  }
  0x99   :  { %250 = vst.msk [vmem:[#allocation0] sm:$0xf] %vm249_vm0, %v248_v46   ;;  %vm537_vm0 = vcmask 130144  }
  0x9a   :  { %268 = vst.msk [vmem:[#allocation0] sm:$0xf] %vm267_vm1, %v266_v47   ;;  %vm555_vm1 = vcmask 97344  }
  0x9b   :  { %286 = vst.msk [vmem:[#allocation0] sm:$0xf] %vm285_vm2, %v284_v42   ;;  %vm573_vm2 = vcmask 64544  }
  0x9f   :  { %v446_v51 = vpop.permute.xlu2 %445  }
  0xa0   :  { %v302_v49 = vpop.permute.xlu0 %301   ;;  %v320_v50 = vpop.permute.xlu1 %319  }
  0xa1   :  { %304 = vst.msk [vmem:[#allocation0] sm:$0xf] %vm303_vm3, %v302_v49  }
  0xa2   :  { %322 = vst.msk [vmem:[#allocation0] sm:$0xf] %vm321_vm4, %v320_v50  }
  0xa3   :  { %340 = vst.msk [vmem:[#allocation0] sm:$0xf] %vm339_vm5, %v338_v45  }
  0xa7   :  { %v500_v54 = vpop.permute.xlu2 %499  }
  0xa8   :  { %v356_v52 = vpop.permute.xlu0 %355   ;;  %v374_v53 = vpop.permute.xlu1 %373  }
  0xa9   :  { %358 = vst.msk [vmem:[#allocation0] sm:$0xf] %vm357_vm6, %v356_v52  }
  0xaa   :  { %376 = vst.msk [vmem:[#allocation0] sm:$0xf] %vm375_vm7, %v374_v53  }
  0xab   :  { %394 = vst.msk [vmem:[#allocation0] sm:$0xf] %vm393_vm8, %v392_v48  }
  0xaf   :  { %v554_v57 = vpop.permute.xlu2 %553  }
  0xb0   :  { %v410_v55 = vpop.permute.xlu0 %409   ;;  %v428_v56 = vpop.permute.xlu1 %427  }
  0xb1   :  { %412 = vst.msk [vmem:[#allocation0] sm:$0xf] %vm411_vm9, %v410_v55  }
  0xb2   :  { %430 = vst.msk [vmem:[#allocation0] sm:$0xf] %vm429_vm10, %v428_v56  }
  0xb3   :  { %448 = vst.msk [vmem:[#allocation0] sm:$0xf] %vm447_vm11, %v446_v51  }
  0xb8   :  { %v464_v58 = vpop.permute.xlu0 %463   ;;  %v482_v59 = vpop.permute.xlu1 %481  }
  0xb9   :  { %466 = vst.msk [vmem:[#allocation0] sm:$0xf] %vm465_vm12, %v464_v58  }
  0xba   :  { %484 = vst.msk [vmem:[#allocation0] sm:$0xf] %vm483_vm13, %v482_v59  }
  0xbb   :  { %502 = vst.msk [vmem:[#allocation0] sm:$0xf] %vm501_vm14, %v500_v54  }
  0xc0   :  { %v518_v60 = vpop.permute.xlu0 %517   ;;  %v536_v61 = vpop.permute.xlu1 %535  }
  0xc1   :  { %520 = vst.msk [vmem:[#allocation0] sm:$0xf] %vm519_vm15, %v518_v60  }
  0xc2   :  { %538 = vst.msk [vmem:[#allocation0] sm:$0xf] %vm537_vm0, %v536_v61  }
  0xc3   :  { %556 = vst.msk [vmem:[#allocation0] sm:$0xf] %vm555_vm1, %v554_v57  }
  0xc8   :  { %v572_v62 = vpop.permute.xlu0 %571  }
  0xc9   :  { %574 = vst.msk [vmem:[#allocation0] sm:$0xf] %vm573_vm2, %v572_v62  }
  0xd0   :  { %v577_v63 = vld [vmem:[#allocation0] sm:$0xf] }
  0xd1   :  { %580 = vst [vmem:[%s1264_s1] sm:$0xf] %v577_v63 }

// kernel: logistic_regression.1
= control target key start
LH: loop header
LB: loop body
LE: loop exit
PB: predicated region body
PF: predicated region fallthrough
CT: control target
= control target key end

     0   :  { %s409_s1 = inlined_call_operand.vmem [shape: f32[512,128], index: 1, kind: input, shape index: {}]   ;;  %s410_s0 = inlined_call_operand.vmem [shape: f32[8,512], index: 0, kind: input, shape index: {}]   ;;  %s411_s2 = inlined_call_operand.<no memory space> [shape: f32[1], index: 2, kind: input, shape index: {}]   ;;  %s412_s3 = inlined_call_operand.vmem [shape: f32[8,128], index: 3, kind: output, shape index: {}]  }
   0x1   :  { %v66_v0 = vld [vmem:[%s409_s1 + $0x178] sm:$0xff]  ;;  %v65_v2 = vld [vmem:[%s409_s1 + $0x170] sm:$0xff]  ;;  %v64_v6 = vld [vmem:[%s409_s1 + $0x168] sm:$0xff] }
   0x2   :  { %v34_v1 = vld [vmem:[%s409_s1 + $0x78] sm:$0xff]  ;;  %125 = vmatpush.msra.mxu2 %v66_v0  ;;  %v33_v4 = vld [vmem:[%s409_s1 + $0x70] sm:$0xff]  ;;  %v32_v8 = vld [vmem:[%s409_s1 + $0x68] sm:$0xff] }
   0x3   :  { %85 = vmatpush.msra.mxu0 %v34_v1  ;;  %v82_v3 = vld [vmem:[%s409_s1 + $0x1f8] sm:$0xff]  ;;  %v81_v7 = vld [vmem:[%s409_s1 + $0x1f0] sm:$0xff]  ;;  %v80_v10 = vld [vmem:[%s409_s1 + $0x1e8] sm:$0xff] }
   0x4   :  { %v50_v5 = vld [vmem:[%s409_s1 + $0xf8] sm:$0xff]  ;;  %145 = vmatpush.msra.mxu3 %v82_v3  ;;  %126 = vmatpush.msra.mxu2 %v65_v2  ;;  %v49_v9 = vld [vmem:[%s409_s1 + $0xf0] sm:$0xff]  ;;  %v63_v11 = vld [vmem:[%s409_s1 + $0x160] sm:$0xff] }
   0x5   :  { %105 = vmatpush.msra.mxu1 %v50_v5  ;;  %86 = vmatpush.msra.mxu0 %v33_v4  ;;  %v31_v12 = vld [vmem:[%s409_s1 + $0x60] sm:$0xff]  ;;  %v48_v13 = vld [vmem:[%s409_s1 + $0xe8] sm:$0xff]  ;;  %v62_v16 = vld [vmem:[%s409_s1 + $0x158] sm:$0xff]  ;;  %v84_v4 = vstv %s411_s2 }
   0x6   :  { %146 = vmatpush.msra.mxu3 %v81_v7  ;;  %127 = vmatpush.msra.mxu2 %v64_v6  ;;  %v79_v14 = vld [vmem:[%s409_s1 + $0x1e0] sm:$0xff]  ;;  %v30_v17 = vld [vmem:[%s409_s1 + $0x58] sm:$0xff]  ;;  %v61_v20 = vld [vmem:[%s409_s1 + $0x150] sm:$0xff] }
   0x7   :  { %106 = vmatpush.msra.mxu1 %v49_v9  ;;  %87 = vmatpush.msra.mxu0 %v32_v8  ;;  %v47_v15 = vld [vmem:[%s409_s1 + $0xe0] sm:$0xff]  ;;  %v78_v18 = vld [vmem:[%s409_s1 + $0x1d8] sm:$0xff]  ;;  %v29_v21 = vld [vmem:[%s409_s1 + $0x50] sm:$0xff] }
   0x8   :  { %147 = vmatpush.msra.mxu3 %v80_v10  ;;  %128 = vmatpush.msra.mxu2 %v63_v11  ;;  %v46_v19 = vld [vmem:[%s409_s1 + $0xd8] sm:$0xff]  ;;  %v77_v22 = vld [vmem:[%s409_s1 + $0x1d0] sm:$0xff]  ;;  %v60_v24 = vld [vmem:[%s409_s1 + $0x148] sm:$0xff] }
   0x9   :  { %107 = vmatpush.msra.mxu1 %v48_v13  ;;  %88 = vmatpush.msra.mxu0 %v31_v12  ;;  %v45_v23 = vld [vmem:[%s409_s1 + $0xd0] sm:$0xff]  ;;  %v28_v25 = vld [vmem:[%s409_s1 + $0x48] sm:$0xff]  ;;  %v59_v28 = vld [vmem:[%s409_s1 + $0x140] sm:$0xff] }
   0xa   :  { %148 = vmatpush.msra.mxu3 %v79_v14  ;;  %129 = vmatpush.msra.mxu2 %v62_v16  ;;  %v76_v26 = vld [vmem:[%s409_s1 + $0x1c8] sm:$0xff]  ;;  %v27_v29 = vld [vmem:[%s409_s1 + $0x40] sm:$0xff]  ;;  %v58_v32 = vld [vmem:[%s409_s1 + $0x138] sm:$0xff] }
   0xb   :  { %108 = vmatpush.msra.mxu1 %v47_v15  ;;  %89 = vmatpush.msra.mxu0 %v30_v17  ;;  %v44_v27 = vld [vmem:[%s409_s1 + $0xc8] sm:$0xff]  ;;  %v75_v30 = vld [vmem:[%s409_s1 + $0x1c0] sm:$0xff]  ;;  %v26_v33 = vld [vmem:[%s409_s1 + $0x38] sm:$0xff] }
   0xc   :  { %149 = vmatpush.msra.mxu3 %v78_v18  ;;  %130 = vmatpush.msra.mxu2 %v61_v20  ;;  %v43_v31 = vld [vmem:[%s409_s1 + $0xc0] sm:$0xff]  ;;  %v74_v34 = vld [vmem:[%s409_s1 + $0x1b8] sm:$0xff]  ;;  %v57_v36 = vld [vmem:[%s409_s1 + $0x130] sm:$0xff] }
   0xd   :  { %109 = vmatpush.msra.mxu1 %v46_v19  ;;  %90 = vmatpush.msra.mxu0 %v29_v21  ;;  %v42_v35 = vld [vmem:[%s409_s1 + $0xb8] sm:$0xff]  ;;  %v25_v37 = vld [vmem:[%s409_s1 + $0x30] sm:$0xff]  ;;  %v56_v40 = vld [vmem:[%s409_s1 + $0x128] sm:$0xff] }
   0xe   :  { %150 = vmatpush.msra.mxu3 %v77_v22  ;;  %131 = vmatpush.msra.mxu2 %v60_v24  ;;  %v73_v38 = vld [vmem:[%s409_s1 + $0x1b0] sm:$0xff]  ;;  %v24_v41 = vld [vmem:[%s409_s1 + $0x28] sm:$0xff]  ;;  %v55_v44 = vld [vmem:[%s409_s1 + $0x120] sm:$0xff] }
   0xf   :  { %110 = vmatpush.msra.mxu1 %v45_v23  ;;  %91 = vmatpush.msra.mxu0 %v28_v25  ;;  %v41_v39 = vld [vmem:[%s409_s1 + $0xb0] sm:$0xff]  ;;  %v72_v42 = vld [vmem:[%s409_s1 + $0x1a8] sm:$0xff]  ;;  %v23_v45 = vld [vmem:[%s409_s1 + $0x20] sm:$0xff] }
  0x10   :  { %151 = vmatpush.msra.mxu3 %v76_v26  ;;  %132 = vmatpush.msra.mxu2 %v59_v28  ;;  %v40_v43 = vld [vmem:[%s409_s1 + $0xa8] sm:$0xff]  ;;  %v71_v46 = vld [vmem:[%s409_s1 + $0x1a0] sm:$0xff]  ;;  %v54_v48 = vld [vmem:[%s409_s1 + $0x118] sm:$0xff] }
  0x11   :  { %111 = vmatpush.msra.mxu1 %v44_v27  ;;  %92 = vmatpush.msra.mxu0 %v27_v29  ;;  %v39_v47 = vld [vmem:[%s409_s1 + $0xa0] sm:$0xff]  ;;  %v22_v49 = vld [vmem:[%s409_s1 + $0x18] sm:$0xff]  ;;  %v53_v52 = vld [vmem:[%s409_s1 + $0x110] sm:$0xff] }
  0x12   :  { %152 = vmatpush.msra.mxu3 %v75_v30  ;;  %133 = vmatpush.msra.mxu2 %v58_v32  ;;  %v70_v50 = vld [vmem:[%s409_s1 + $0x198] sm:$0xff]  ;;  %v21_v53 = vld [vmem:[%s409_s1 + $0x10] sm:$0xff]  ;;  %v52_v56 = vld [vmem:[%s409_s1 + $0x108] sm:$0xff] }
  0x13   :  { %112 = vmatpush.msra.mxu1 %v43_v31  ;;  %93 = vmatpush.msra.mxu0 %v26_v33  ;;  %v38_v51 = vld [vmem:[%s409_s1 + $0x98] sm:$0xff]  ;;  %v69_v54 = vld [vmem:[%s409_s1 + $0x190] sm:$0xff]  ;;  %v20_v57 = vld [vmem:[%s409_s1 + $0x8] sm:$0xff] }
  0x14   :  { %153 = vmatpush.msra.mxu3 %v74_v34  ;;  %134 = vmatpush.msra.mxu2 %v57_v36  ;;  %v37_v55 = vld [vmem:[%s409_s1 + $0x90] sm:$0xff]  ;;  %v68_v58 = vld [vmem:[%s409_s1 + $0x188] sm:$0xff]  ;;  %v51_v60 = vld [vmem:[%s409_s1 + $0x100] sm:$0xff] }
  0x15   :  { %113 = vmatpush.msra.mxu1 %v42_v35  ;;  %94 = vmatpush.msra.mxu0 %v25_v37  ;;  %v36_v59 = vld [vmem:[%s409_s1 + $0x88] sm:$0xff]  ;;  %v19_v61 = vld [vmem:[%s409_s1] sm:$0xff]  ;;  %v17_v62 = vld [vmem:[%s410_s0 + $0x10] sm:$0xff] }
  0x16   :  { %154 = vmatpush.msra.mxu3 %v73_v38  ;;  %135 = vmatpush.msra.mxu2 %v56_v40  ;;  %v67_v63 = vld [vmem:[%s409_s1 + $0x180] sm:$0xff]  ;;  %v18_v1 = vld [vmem:[%s410_s0 + $0x18] sm:$0xff]  ;;  %v16_v3 = vld [vmem:[%s410_s0 + $0x8] sm:$0xff] }
  0x17   :  { %114 = vmatpush.msra.mxu1 %v41_v39  ;;  %95 = vmatpush.msra.mxu0 %v24_v41  ;;  %v15_v0 = vld [vmem:[%s410_s0] sm:$0xff] }
  0x18   :  { %155 = vmatpush.msra.mxu3 %v72_v42  ;;  %136 = vmatpush.msra.mxu2 %v55_v44  ;;  %v35_v2 = vld [vmem:[%s409_s1 + $0x80] sm:$0xff] }
  0x19   :  { %115 = vmatpush.msra.mxu1 %v40_v43  ;;  %96 = vmatpush.msra.mxu0 %v23_v45 }
  0x1a   :  { %156 = vmatpush.msra.mxu3 %v71_v46  ;;  %137 = vmatpush.msra.mxu2 %v54_v48 }
  0x1b   :  { %116 = vmatpush.msra.mxu1 %v39_v47  ;;  %97 = vmatpush.msra.mxu0 %v22_v49 }
  0x1c   :  { %157 = vmatpush.msra.mxu3 %v70_v50  ;;  %138 = vmatpush.msra.mxu2 %v53_v52 }
  0x1d   :  { %117 = vmatpush.msra.mxu1 %v38_v51  ;;  %98 = vmatpush.msra.mxu0 %v21_v53 }
  0x1e   :  { %158 = vmatpush.msra.mxu3 %v69_v54  ;;  %139 = vmatpush.msra.mxu2 %v52_v56 }
  0x1f   :  { %118 = vmatpush.msra.mxu1 %v37_v55  ;;  %99 = vmatpush.msra.mxu0 %v20_v57 }
  0x20   :  { %159 = vmatpush.msra.mxu3 %v68_v58  ;;  %140 = vmatpush.msra.mxu2 %v51_v60 }
  0x21   :  { %119 = vmatpush.msra.mxu1 %v36_v59  ;;  %100 = vmatpush.msra.mxu0 %v19_v61 }
  0x22   :  { %141 = vmatmul.f32.vlgmr.msra.gmra.mxu2 %v17_v62  ;;  %160 = vmatpush.msra.mxu3 %v67_v63 }
  0x23   :  { %101 = vmatmul.f32.vlgmr.msra.gmra.mxu0 %v15_v0  ;;  %161 = vmatmul.f32.vlgmr.msra.gmra.mxu3 %v18_v1 }
  0x24   :  { %120 = vmatpush.msra.mxu1 %v35_v2 }
  0x25   :  { %121 = vmatmul.f32.vlgmr.msra.gmra.mxu1 %v16_v3 }
  0xa0   :  { %v102_v5 = vpop.f32.mrf.mxu0 }
  0xa1   :  { %v103_v6 = vadd.f32 %v102_v5, %v84_v4 }
  0xa2   :  { %v122_v7 = vpop.f32.mrf.mxu1 }
  0xa3   :  { %v123_v8 = vadd.f32 %v122_v7, %v103_v6 }
  0xa5   :  { %v142_v9 = vpop.f32.mrf.mxu2 }
  0xa6   :  { %v143_v10 = vadd.f32 %v142_v9, %v123_v8  ;;  %v162_v11 = vpop.f32.mrf.mxu3 }
  0xa8   :  { %v163_v12 = vadd.f32 %v162_v11, %v143_v10 }
  0xaa   :  { %v165_v13 = vsub.f32 0.0, %v163_v12 }
  0xac   :  { %v166_v14 = vmul.f32 1.442695, %v165_v13 }
  0xae   :  { %175 = vpow2.f32 %v166_v14 }
  0xb4   :  { %v176_v15 = vpop.eup %175 }
  0xb5   :  { %v168_v16 = vadd.f32 1.0, %v176_v15 }
  0xb7   :  { %177 = vrcp.f32 %v168_v16 }
  0xbd   :  { %v178_v17 = vpop.eup %177 }
  0xbe   :  { %170 = vst [vmem:[%s412_s3] sm:$0xff] %v178_v17 }

</bundles_post_ra>
